<compile_context>
chip_gen: v7x
topology: tpu7x:2x2x1
jax: 0.10.0
libtpu: 0.0.40
codegen_flags: <defaults>
</compile_context>

<pallas_src>
import functools

import jax
import jax.numpy as jnp
from jax.experimental import pallas as pl
from jax.experimental.pallas import tpu as pltpu

REPARAM_NOISE = 1e-6
HEAD_PAD = 128  # lane-dense padded width of the fused mu|sigma head weight


def _round_up(x, m):
    return (x + m - 1) // m * m


def actor_forward_kernel(n_actions, x_ref, w1_ref, b1_ref, w2_ref, b2_ref,
                         wh_ref, bh_ref, mu_ref, sigma_ref):
    # In-kernel f32 -> bf16 cast of the activations (no wrapper-side pass).
    x = x_ref[...].astype(jnp.bfloat16)

    # fc1 + relu (bf16 operands, f32 MXU accumulation)
    h1 = jnp.dot(x, w1_ref[...], preferred_element_type=jnp.float32) + b1_ref[...]
    h1 = jnp.maximum(h1, 0.0)

    # fc2 + relu
    h2 = jnp.dot(h1.astype(jnp.bfloat16), w2_ref[...],
                 preferred_element_type=jnp.float32) + b2_ref[...]
    h2 = jnp.maximum(h2, 0.0)

    # fused mu|sigma head: single MXU matmul into a 128-lane slab (compute
    # stays lane-dense), but only the 2*n_actions useful lanes are stored.
    head = jnp.dot(h2.astype(jnp.bfloat16), wh_ref[...],
                   preferred_element_type=jnp.float32) + bh_ref[...]

    mu_ref[...] = head[:, :n_actions]
    sigma_ref[...] = jnp.clip(head[:, n_actions:2 * n_actions],
                              REPARAM_NOISE, 1.0)


def pack_params(params, n_actions):
    """Pack f32 Linear params into kernel layout:
    bf16 pre-transposed weights, fused + lane-padded (hidden2, 128) head."""
    assert 2 * n_actions <= HEAD_PAD, (
        f"2*n_actions={2 * n_actions} must fit in HEAD_PAD={HEAD_PAD}")
    w1, b1, w2, b2, wmu, bmu, wsig, bsig = params
    h2 = w2.shape[1]
    wh = jnp.zeros((h2, HEAD_PAD), jnp.float32)
    wh = wh.at[:, :n_actions].set(wmu).at[:, n_actions:2 * n_actions].set(wsig)
    bh = jnp.zeros((1, HEAD_PAD), jnp.float32)
    bh = bh.at[:, :n_actions].set(bmu).at[:, n_actions:2 * n_actions].set(bsig)
    return (w1.astype(jnp.bfloat16), b1.astype(jnp.float32),
            w2.astype(jnp.bfloat16), b2.astype(jnp.float32),
            wh.astype(jnp.bfloat16), bh.astype(jnp.float32))


@functools.partial(jax.jit, static_argnames=("n_actions", "tb"))
def actor_forward(state, packed, *, n_actions, tb=2048):
    """Fused SAC ActorNetwork forward. Returns (mu, sigma)."""
    w1, b1, w2, b2, wh, bh = packed
    B, in_dim = state.shape

    # 16-row alignment (bf16 packs 2 rows/sublane).  Cap the tile so the
    # parallel grid has >=2 steps when the batch allows (both v7x TCs); tile
    # is VMEM-safe on v7x (64 MiB) as well as v5e/v6e.
    B16 = _round_up(B, 16)
    TB = min(tb, B16)
    if B16 >= 32:  # enough rows for two >=16-row tiles
        TB = min(TB, _round_up(pl.cdiv(B16, 2), 16))
    B_pad = _round_up(B, TB)

    x = state
    if B_pad != B:  # skip the pad copy when already aligned
        x = jnp.pad(x, ((0, B_pad - B), (0, 0)))

    resident = lambda arr: pl.BlockSpec(arr.shape, lambda i: (0, 0))

    mu, sigma = pl.pallas_call(
        functools.partial(actor_forward_kernel, n_actions),
        out_shape=(jax.ShapeDtypeStruct((B_pad, n_actions), jnp.float32),
                   jax.ShapeDtypeStruct((B_pad, n_actions), jnp.float32)),
        grid=(B_pad // TB,),
        in_specs=[
            pl.BlockSpec((TB, in_dim), lambda i: (i, 0)),   # state rows (f32)
            resident(w1), resident(b1),                     # weights stay resident
            resident(w2), resident(b2),
            resident(wh), resident(bh),
        ],
        out_specs=(pl.BlockSpec((TB, n_actions), lambda i: (i, 0)),
                   pl.BlockSpec((TB, n_actions), lambda i: (i, 0))),
        compiler_params=pltpu.CompilerParams(
            dimension_semantics=("parallel",),              # both TCs on v7x
            vmem_limit_bytes=48 * 1024 * 1024),             # headroom for big TB
    )(x, w1, b1, w2, b2, wh, bh)

    if B_pad != B:
        mu, sigma = mu[:B], sigma[:B]
    return mu, sigma


def init_params(key, input_dim, h1, h2, n_actions):
    """Deterministic synthetic parameter init (uniform, nn.Linear-style bound)."""
    ks = jax.random.split(key, 8)

    def lin(kw, kb, fan_in, fan_out):
        bound = 1.0 / jnp.sqrt(jnp.float32(fan_in))
        w = jax.random.uniform(kw, (fan_in, fan_out), jnp.float32, -bound, bound)
        b = jax.random.uniform(kb, (1, fan_out), jnp.float32, -bound, bound)
        return w, b

    w1, b1 = lin(ks[0], ks[1], input_dim, h1)
    w2, b2 = lin(ks[2], ks[3], h1, h2)
    wmu, bmu = lin(ks[4], ks[5], h2, n_actions)
    wsig, bsig = lin(ks[6], ks[7], h2, n_actions)
    return (w1, b1, w2, b2, wmu, bmu, wsig, bsig)


def actor_forward_ref(state, params, *, bf16=True):
    """Pure-JAX reference. bf16=True mirrors the kernel's bf16 MXU inputs."""
    w1, b1, w2, b2, wmu, bmu, wsig, bsig = params
    cast = (lambda a: a.astype(jnp.bfloat16)) if bf16 else (lambda a: a)
    dot = lambda a, w: jnp.dot(cast(a), cast(w), preferred_element_type=jnp.float32)
    h1 = jnp.maximum(dot(state, w1) + b1, 0.0)
    h2 = jnp.maximum(dot(h1, w2) + b2, 0.0)
    mu = dot(h2, wmu) + bmu
    sigma = jnp.clip(dot(h2, wsig) + bsig, REPARAM_NOISE, 1.0)
    return mu, sigma


if __name__ == "__main__":
    # Small shapes consistent with the module defaults: hidden 256, n_actions 2.
    batch = 64          # 16-aligned; kernel splits into two 32-row tiles
    input_dim = 8
    hidden1 = 256       # module default; also 128-lane aligned
    hidden2 = 256
    n_actions = 2

    key = jax.random.PRNGKey(0)
    k_state, k_params = jax.random.split(key)

    state = jax.random.normal(k_state, (batch, input_dim), jnp.float32)
    params = init_params(k_params, input_dim, hidden1, hidden2, n_actions)
    packed = pack_params(params, n_actions)

    mu, sigma = actor_forward(state, packed, n_actions=n_actions)
    jax.block_until_ready((mu, sigma))

    # Correctness vs. a bf16-matched reference (tight) and the f32 reference (loose).
    mu_bf, sigma_bf = actor_forward_ref(state, params, bf16=True)
    mu_f32, sigma_f32 = actor_forward_ref(state, params, bf16=False)

    assert mu.shape == (batch, n_actions) and sigma.shape == (batch, n_actions)
    assert jnp.allclose(mu, mu_bf, atol=1e-3, rtol=1e-3)
    assert jnp.allclose(sigma, sigma_bf, atol=1e-3, rtol=1e-3)
    assert jnp.allclose(mu, mu_f32, atol=5e-2, rtol=5e-2)
    assert jnp.allclose(sigma, sigma_f32, atol=5e-2, rtol=5e-2)
    assert bool(jnp.all(sigma >= REPARAM_NOISE)) and bool(jnp.all(sigma <= 1.0))

    # TODO(synk): sample_normal (rsample + tanh squash + log_prob) could be fused
    # into the kernel epilogue with pltpu.prng_seed/prng_random_bits if needed.
    print("KERNEL_OK")
</pallas_src>

<mosaic_0001>
module attributes {stable_mosaic.version = 11 : i64} {
  func.func @actor_forward_kernel(%arg0: i32, %arg1: memref<32x8xf32, #tpu.memory_space<vmem>>, %arg2: memref<8x256xbf16, #tpu.memory_space<vmem>>, %arg3: memref<1x256xf32, #tpu.memory_space<vmem>>, %arg4: memref<256x256xbf16, #tpu.memory_space<vmem>>, %arg5: memref<1x256xf32, #tpu.memory_space<vmem>>, %arg6: memref<256x128xbf16, #tpu.memory_space<vmem>>, %arg7: memref<1x128xf32, #tpu.memory_space<vmem>>, %arg8: memref<32x2xf32, #tpu.memory_space<vmem>>, %arg9: memref<32x2xf32, #tpu.memory_space<vmem>>) attributes {dimension_semantics = [#tpu.dimension_semantics<parallel>], iteration_bounds = array<i64: 2>, scalar_prefetch = 0 : i64, scratch_operands = 0 : i64, tpu.core_type = #tpu.core_type<tc>, window_params = [{transform_indices = @transform_0, window_bounds = array<i64: 32, 8>}, {pipeline_mode = #tpu.pipeline_mode<synchronous>, transform_indices = @transform_1, window_bounds = array<i64: 8, 256>}, {pipeline_mode = #tpu.pipeline_mode<synchronous>, transform_indices = @transform_2, window_bounds = array<i64: 1, 256>}, {pipeline_mode = #tpu.pipeline_mode<synchronous>, transform_indices = @transform_3, window_bounds = array<i64: 256, 256>}, {pipeline_mode = #tpu.pipeline_mode<synchronous>, transform_indices = @transform_4, window_bounds = array<i64: 1, 256>}, {pipeline_mode = #tpu.pipeline_mode<synchronous>, transform_indices = @transform_5, window_bounds = array<i64: 256, 128>}, {pipeline_mode = #tpu.pipeline_mode<synchronous>, transform_indices = @transform_6, window_bounds = array<i64: 1, 128>}, {transform_indices = @transform_7, window_bounds = array<i64: 32, 2>}, {transform_indices = @transform_8, window_bounds = array<i64: 32, 2>}]} {
    %c0 = arith.constant 0 : index
    %c0_0 = arith.constant 0 : index
    %0 = vector.load %arg1[%c0, %c0_0] : memref<32x8xf32, #tpu.memory_space<vmem>>, vector<32x8xf32>
    %1 = arith.truncf %0 : vector<32x8xf32> to vector<32x8xbf16>
    %c0_1 = arith.constant 0 : index
    %c0_2 = arith.constant 0 : index
    %2 = vector.load %arg2[%c0_1, %c0_2] : memref<8x256xbf16, #tpu.memory_space<vmem>>, vector<8x256xbf16>
    %cst = arith.constant dense<0.000000e+00> : vector<32x256xf32>
    %3 = tpu.matmul %1, %2, %cst {dimension_numbers = #tpu.dot_dimension_numbers<[1], [0], [0], [1], [0, 0, 1, 1], [], []>} : vector<32x8xbf16>, vector<8x256xbf16>, vector<32x256xf32> -> vector<32x256xf32>
    %c0_3 = arith.constant 0 : index
    %c0_4 = arith.constant 0 : index
    %4 = vector.load %arg3[%c0_3, %c0_4] : memref<1x256xf32, #tpu.memory_space<vmem>>, vector<1x256xf32>
    %5 = vector.broadcast %4 : vector<1x256xf32> to vector<32x256xf32>
    %6 = arith.addf %3, %5 : vector<32x256xf32>
    %cst_5 = arith.constant 0.000000e+00 : f32
    %7 = vector.broadcast %cst_5 : f32 to vector<32x256xf32>
    %8 = arith.maximumf %6, %7 : vector<32x256xf32>
    %9 = arith.truncf %8 : vector<32x256xf32> to vector<32x256xbf16>
    %c0_6 = arith.constant 0 : index
    %c0_7 = arith.constant 0 : index
    %10 = vector.load %arg4[%c0_6, %c0_7] : memref<256x256xbf16, #tpu.memory_space<vmem>>, vector<256x256xbf16>
    %cst_8 = arith.constant dense<0.000000e+00> : vector<32x256xf32>
    %11 = tpu.matmul %9, %10, %cst_8 {dimension_numbers = #tpu.dot_dimension_numbers<[1], [0], [0], [1], [0, 0, 1, 1], [], []>} : vector<32x256xbf16>, vector<256x256xbf16>, vector<32x256xf32> -> vector<32x256xf32>
    %c0_9 = arith.constant 0 : index
    %c0_10 = arith.constant 0 : index
    %12 = vector.load %arg5[%c0_9, %c0_10] : memref<1x256xf32, #tpu.memory_space<vmem>>, vector<1x256xf32>
    %13 = vector.broadcast %12 : vector<1x256xf32> to vector<32x256xf32>
    %14 = arith.addf %11, %13 : vector<32x256xf32>
    %cst_11 = arith.constant 0.000000e+00 : f32
    %15 = vector.broadcast %cst_11 : f32 to vector<32x256xf32>
    %16 = arith.maximumf %14, %15 : vector<32x256xf32>
    %17 = arith.truncf %16 : vector<32x256xf32> to vector<32x256xbf16>
    %c0_12 = arith.constant 0 : index
    %c0_13 = arith.constant 0 : index
    %18 = vector.load %arg6[%c0_12, %c0_13] : memref<256x128xbf16, #tpu.memory_space<vmem>>, vector<256x128xbf16>
    %cst_14 = arith.constant dense<0.000000e+00> : vector<32x128xf32>
    %19 = tpu.matmul %17, %18, %cst_14 {dimension_numbers = #tpu.dot_dimension_numbers<[1], [0], [0], [1], [0, 0, 1, 1], [], []>} : vector<32x256xbf16>, vector<256x128xbf16>, vector<32x128xf32> -> vector<32x128xf32>
    %c0_15 = arith.constant 0 : index
    %c0_16 = arith.constant 0 : index
    %20 = vector.load %arg7[%c0_15, %c0_16] : memref<1x128xf32, #tpu.memory_space<vmem>>, vector<1x128xf32>
    %21 = vector.broadcast %20 : vector<1x128xf32> to vector<32x128xf32>
    %22 = arith.addf %19, %21 : vector<32x128xf32>
    %23 = vector.extract_strided_slice %22 {offsets = [0, 0], sizes = [32, 2], strides = [1, 1]} : vector<32x128xf32> to vector<32x2xf32>
    %c0_17 = arith.constant 0 : index
    %c0_18 = arith.constant 0 : index
    %24 = vector.load %arg8[%c0_17, %c0_18] : memref<32x2xf32, #tpu.memory_space<vmem>>, vector<32x2xf32>
    tpu.vector_store %arg8[%c0_17, %c0_18], %23 {strides = array<i32>} : memref<32x2xf32, #tpu.memory_space<vmem>>, vector<32x2xf32>,
    %25 = vector.extract_strided_slice %22 {offsets = [0, 2], sizes = [32, 2], strides = [1, 1]} : vector<32x128xf32> to vector<32x2xf32>
    %cst_19 = arith.constant 9.99999997E-7 : f32
    %cst_20 = arith.constant 1.000000e+00 : f32
    %26 = vector.broadcast %cst_19 : f32 to vector<32x2xf32>
    %27 = arith.maximumf %26, %25 : vector<32x2xf32>
    %28 = vector.broadcast %cst_20 : f32 to vector<32x2xf32>
    %29 = arith.minimumf %28, %27 : vector<32x2xf32>
    %c0_21 = arith.constant 0 : index
    %c0_22 = arith.constant 0 : index
    %30 = vector.load %arg9[%c0_21, %c0_22] : memref<32x2xf32, #tpu.memory_space<vmem>>, vector<32x2xf32>
    tpu.vector_store %arg9[%c0_21, %c0_22], %29 {strides = array<i32>} : memref<32x2xf32, #tpu.memory_space<vmem>>, vector<32x2xf32>,
    return
  }
  func.func @transform_0(%arg0: i32) -> (i32, i32) {
    %c0_i32 = arith.constant 0 : i32
    %c0_i32_0 = arith.constant 0 : i32
    return %arg0, %c0_i32 : i32, i32
  }
  func.func @transform_1(%arg0: i32) -> (i32, i32) {
    %c0_i32 = arith.constant 0 : i32
    %c0_i32_0 = arith.constant 0 : i32
    %c0_i32_1 = arith.constant 0 : i32
    return %c0_i32, %c0_i32_0 : i32, i32
  }
  func.func @transform_2(%arg0: i32) -> (i32, i32) {
    %c0_i32 = arith.constant 0 : i32
    %c0_i32_0 = arith.constant 0 : i32
    %c0_i32_1 = arith.constant 0 : i32
    return %c0_i32, %c0_i32_0 : i32, i32
  }
  func.func @transform_3(%arg0: i32) -> (i32, i32) {
    %c0_i32 = arith.constant 0 : i32
    %c0_i32_0 = arith.constant 0 : i32
    %c0_i32_1 = arith.constant 0 : i32
    return %c0_i32, %c0_i32_0 : i32, i32
  }
  func.func @transform_4(%arg0: i32) -> (i32, i32) {
    %c0_i32 = arith.constant 0 : i32
    %c0_i32_0 = arith.constant 0 : i32
    %c0_i32_1 = arith.constant 0 : i32
    return %c0_i32, %c0_i32_0 : i32, i32
  }
  func.func @transform_5(%arg0: i32) -> (i32, i32) {
    %c0_i32 = arith.constant 0 : i32
    %c0_i32_0 = arith.constant 0 : i32
    %c0_i32_1 = arith.constant 0 : i32
    return %c0_i32, %c0_i32_0 : i32, i32
  }
  func.func @transform_6(%arg0: i32) -> (i32, i32) {
    %c0_i32 = arith.constant 0 : i32
    %c0_i32_0 = arith.constant 0 : i32
    %c0_i32_1 = arith.constant 0 : i32
    return %c0_i32, %c0_i32_0 : i32, i32
  }
  func.func @transform_7(%arg0: i32) -> (i32, i32) {
    %c0_i32 = arith.constant 0 : i32
    %c0_i32_0 = arith.constant 0 : i32
    return %arg0, %c0_i32 : i32, i32
  }
  func.func @transform_8(%arg0: i32) -> (i32, i32) {
    %c0_i32 = arith.constant 0 : i32
    %c0_i32_0 = arith.constant 0 : i32
    return %arg0, %c0_i32 : i32, i32
  }
}

</mosaic_0001>

<bundles_post_ra>
// kernel: actor_forward.1
= control target key start
LH: loop header
LB: loop body
LE: loop exit
PB: predicated region body
PF: predicated region fallthrough
CT: control target
= control target key end

     0   :  { %14 = vsyncpa [#allocation3], 0  ;;  %s1506_s0 = inlined_call_operand.vmem [shape: f32[64,8], index: 0, kind: input, shape index: {}]   ;;  %s1507_s1 = inlined_call_operand.vmem [shape: bf16[8,256], index: 1, kind: input, shape index: {}]   ;;  %s1508_s2 = inlined_call_operand.vmem [shape: f32[1,256], index: 2, kind: input, shape index: {}]   ;;  %s1509_s3 = inlined_call_operand.hbm [shape: bf16[256,256], index: 3, kind: input, shape index: {}]   ;;  %s1510_s4 = inlined_call_operand.vmem [shape: f32[1,256], index: 4, kind: input, shape index: {}]   ;;  %s1511_s5 = inlined_call_operand.hbm [shape: bf16[256,128], index: 5, kind: input, shape index: {}]   ;;  %s1512_s6 = inlined_call_operand.vmem [shape: f32[1,128], index: 6, kind: input, shape index: {}]   ;;  %s1513_s7 = inlined_call_operand.vmem [shape: f32[64,2], index: 7, kind: output, shape index: {0}]   ;;  %s1514_s8 = inlined_call_operand.vmem [shape: f32[64,2], index: 8, kind: output, shape index: {1}]  }
   0x1   :  { %15 = vsyncpa [#allocation5], 0  ;;  %s1380_s27 = smov 0  }
   0x2 LB: > { %s1327_s28 = smov [#allocation2]   ;;  %s1055_s30 = sadd.s32 4294967295, %s1325_s27   ;;  %s1325_s27 = sphi %s1380_s27, %s21_s27  }
   0x3   : > { %s248_s29 = sshll.u32 %s1327_s28, 4  ;;  %p1057_p0 = scmp.ge.s32.totalorder %s1325_s27, 1  ;;  %s249_s29 = int_to_ptr.vmem [resolvable:$true] %s248_s29 }
   0x4   : > { %p230_p1 = scmp.lt.s32.totalorder %s1325_s27, 3  ;;  %p1394_p3 = scmp.eq.s32.totalorder %s1055_s30, 0 }
   0x5   : > { %s1328_s11 = smov [#allocation4]   ;;  %s1255_s16 = scalar_lea.hbm %s1509_s3, 4096 }
   0x6   : > { %p1388_p2 = pnand %p1057_p0, %p230_p1  ;;  %s264_s12 = sshll.u32 %s1328_s11, 4  ;;  %s1406_s12 = int_to_ptr.vmem [resolvable:$true] %s264_s12 }
   0x7   : > { %s1519_s10 = scalar_select %p1394_p3, 1, 0 }
   0x8   : > { %s1518_s9 = scalar_select %p1388_p2, 1, 0 }
   0x9   : > { %p1162_p4 = pneg %p1388_p2  ;;  %p1256_p6 = scmp.ne.s32.totalorder %s1509_s3, %s1255_s16 }
   0xa   : > { %p1262_p10 = scmp.lt.u32.totalorder %s1255_s16, %s1509_s3 }
   0xb   : > { %p1402_p5 = pnand %p1394_p3, %p1162_p4 }
   0xd   : > { %p1257_p7 = pneg %p1402_p5 }
   0xf   : > { %p1258_p8 = pnand %p1257_p7, %p1256_p6 }
  0x11   : > { %p1259_p9 = pneg %p1258_p8 }
  0x13   : > { %p1264_p11 = pnand %p1262_p10, %p1259_p9 }
  0x15   : > { %1267 = shalt.err (!%p1264_p11)
}
  0x16   : > { %s1268_s21 = scalar_lea.vmem %s249_s29, 4096  ;;  %p1276_p1 = scmp.lt.s32.totalorder %s249_s29, %s249_s29 }
  0x17   : > { %p1269_p12 = scmp.ne.s32.totalorder %s249_s29, %s1268_s21  ;;  %p1277_p4 = scmp.lt.s32.totalorder %s1268_s21, %s1268_s21 }
  0x19   : > { %p1271_p13 = pnand %p1269_p12, %p1257_p7  ;;  %p1278_p3 = por %p1277_p4, %p1276_p1 }
  0x1b   : > { %p1272_p0 = pneg %p1271_p13 }
  0x1d   : > { %p1279_p2 = pnand %p1278_p3, %p1272_p0 }
  0x1f   : > { %1282 = shalt.err (!%p1279_p2)
}
  0x20   : > { %s1329_s22 = smov 128   ;;  %s1330_s23 = smov 8  }
  0x21   : > { %1165 = dma.hbm_to_vmem [thread:$0]  (!%p1402_p5), %s1509_s3, 4096, %s249_s29, [#allocation3], %s1329_s22, %s1329_s22, %s1330_s23  }
  0x22   : > { %s1283_s11 = scalar_lea.hbm %s1511_s5, 2048 }
  0x23   : > { %p1284_p6 = scmp.ne.s32.totalorder %s1511_s5, %s1283_s11  ;;  %p1290_p8 = scmp.lt.u32.totalorder %s1283_s11, %s1511_s5 }
  0x25   : > { %p1286_p2 = pnand %p1284_p6, %p1257_p7 }
  0x27   : > { %p1287_p3 = pneg %p1286_p2 }
  0x29   : > { %p1292_p9 = pnand %p1290_p8, %p1287_p3 }
  0x2b   : > { %1295 = shalt.err (!%p1292_p9)
}
  0x2c   : > { %s1296_s29 = scalar_lea.vmem %s1406_s12, 2048  ;;  %p1304_p13 = scmp.lt.s32.totalorder %s1406_s12, %s1406_s12 }
  0x2d   : > { %p1297_p10 = scmp.ne.s32.totalorder %s1406_s12, %s1296_s29  ;;  %p1305_p0 = scmp.lt.s32.totalorder %s1296_s29, %s1296_s29 }
  0x2f   : > { %p1299_p11 = pnand %p1297_p10, %p1257_p7  ;;  %p1306_p1 = por %p1305_p0, %p1304_p13 }
  0x31   : > { %p1300_p12 = pneg %p1299_p11 }
  0x33   : > { %p1307_p4 = pnand %p1306_p1, %p1300_p12 }
  0x35   : > { %1310 = shalt.err (!%p1307_p4)
}
  0x36   : > { %s1331_s18 = smov 64   ;;  %s1332_s19 = smov 4  }
  0x37   : > { %1168 = dma.hbm_to_vmem [thread:$0]  (!%p1402_p5), %s1511_s5, 2048, %s1406_s12, [#allocation5], %s1331_s18, %s1331_s18, %s1332_s19  }
  0x38   : > { %p1521_p6 = scmp.ne.s32.totalorder %s1518_s9, 0 }
  0x39   : > { %p1522_p7 = scmp.ne.s32.totalorder (!%p1521_p6), %s1519_s10, 0 }
  0x3a   : > { %292 = sbr.rel (%p1521_p6) target bundleno = 870 (0x366), region = 48 }
  0x41   : > { %1316 = dma.done.wait (%p1522_p7), [#allocation3], 4096  }
  0x42   : > { %1318 = vsyncadd (%p1522_p7), [#allocation3], 4294963200 }
  0x43   : > { %1320 = dma.done.wait (%p1522_p7), [#allocation5], 2048  }
  0x44   : > { %1322 = vsyncadd (%p1522_p7), [#allocation5], 4294965248  ;;  %s1064_s13 = sshll.u32 %s1055_s30, 2  ;;  %v1333_v0 = vmov 0   ;;  %v360_v1 = vld [vmem:[%s1507_s1] sm:$0xff]  ;;  %vm385_vm0 = vcmask 1043456   ;;  %v363_v54 = vlaneseq }
  0x45   : > { %424 = vmatprep.mubr.bf16.mxu0 %v1333_v0  ;;  %p336_p5 = scmp.lt.s32.totalorder %s1064_s13, 7  ;;  %v1071_v4 = vcombine.high %v360_v1, %v360_v1  ;;  %v1070_v5 = vcombine.low %v360_v1, %v360_v1  ;;  %v1191_v6 = vld [vmem:[#allocation2 + $0x4] ss:$8 sps:$4 sm:$0xff]   ;;  %v1193_v7 = vld [vmem:[#allocation2] ss:$8 sps:$4 sm:$0xff]   ;;  %vm378_vm1 = vcmask 64512  }
  0x46   : > { %v1194_v10 = vld [vmem:[#allocation2 + $0x14] ss:$8 sps:$4 sm:$0xff]   ;;  %661 = vmatprep.subr.bf16.mxu1 %v1191_v6  ;;  %v1196_v11 = vld [vmem:[#allocation2 + $0x10] ss:$8 sps:$4 sm:$0xff]   ;;  %v1197_v12 = vld [vmem:[#allocation2 + $0x24] ss:$8 sps:$4 sm:$0xff]  }
  0x47   : > { %s1524_s13 = smov (!%p336_p5, %s1064_s13), 7  ;;  %1072 = vmatprep.subr.msk.bf16.mxu0 %vm385_vm0, %v1071_v4  ;;  %v387_v8 = vsel %vm385_vm0, %v1070_v5, 0  ;;  %662 = vmatpush1.bf16.msra.mxu1 %v1193_v7  ;;  %v1199_v15 = vld [vmem:[#allocation2 + $0x20] ss:$8 sps:$4 sm:$0xff]   ;;  %v1200_v16 = vld [vmem:[#allocation2 + $0x34] ss:$8 sps:$4 sm:$0xff]  }
  0x48   : > { %s1467_s9 = sshll.u32 %s1524_s13, 3  ;;  %393 = vmatpush1.bf16.msra.mxu0 %v387_v8  ;;  %663 = vmatprep.subr.bf16.mxu1 %v1194_v10  ;;  %v1202_v18 = vld [vmem:[#allocation2 + $0x30] ss:$8 sps:$4 sm:$0xff]   ;;  %v1203_v19 = vld [vmem:[#allocation2 + $0x44] ss:$8 sps:$4 sm:$0xff]   ;;  %v364_v55 = vshrl.u32 %v363_v54, 7 }
  0x49   : > { %s339_s23 = scalar_lea.vmem %s1506_s0, %s1467_s9  ;;  %v1205_v20 = vld [vmem:[#allocation2 + $0x40] ss:$8 sps:$4 sm:$0xff]   ;;  %v1206_v21 = vld [vmem:[#allocation2 + $0x54] ss:$8 sps:$4 sm:$0xff]   ;;  %v1208_v22 = vld [vmem:[#allocation2 + $0x50] ss:$8 sps:$4 sm:$0xff]   ;;  %s345_s17 = scalar_lea.vmem %s1513_s7, %s1467_s9 }
  0x4a   : > { %v354_v2 = vld [vmem:[%s339_s23] sm:$0xff]  ;;  %v355_v3 = vld [vmem:[%s339_s23 + $0x8] sm:$0xff]  ;;  %v356_v13 = vld [vmem:[%s339_s23 + $0x10] sm:$0xff]  ;;  %v365_v56 = vsub.s32 0, %v364_v55  ;;  %v369_v58 = vsub.s32 1, %v364_v55  ;;  %vm910_vm2 = vcmask 15360   ;;  %s351_s20 = scalar_lea.vmem %s1514_s8, %s1467_s9 }
  0x4b   : > { %v358_v9 = vpack.c.bf16 %v355_v3, %v354_v2  ;;  %v357_v14 = vld [vmem:[%s339_s23 + $0x18] sm:$0xff]  ;;  %664 = vmatpush1.bf16.msra.mxu1 %v1196_v11  ;;  %v1209_v23 = vld [vmem:[#allocation2 + $0x64] ss:$8 sps:$4 sm:$0xff]   ;;  %v1211_v24 = vld [vmem:[#allocation2 + $0x60] ss:$8 sps:$4 sm:$0xff]   ;;  %s1334_s29 = smov 126  }
  0x4c   : > { %665 = vmatprep.subr.bf16.mxu1 %v1197_v12  ;;  %v359_v17 = vpack.c.bf16 %v357_v14, %v356_v13  ;;  %v1212_v25 = vld [vmem:[#allocation2 + $0x74] ss:$8 sps:$4 sm:$0xff]   ;;  %v1214_v26 = vld [vmem:[#allocation2 + $0x70] ss:$8 sps:$4 sm:$0xff]   ;;  %v1215_v27 = vld [vmem:[#allocation2 + $0x84] ss:$8 sps:$4 sm:$0xff]  }
  0x4d   : > { %1073 = vmatmul.mubr.msk.bf16.vlgmr.msra.gmra.mrb[0].mxu0 %vm378_vm1, %v358_v9  ;;  %v1217_v28 = vld [vmem:[#allocation2 + $0x80] ss:$8 sps:$4 sm:$0xff]   ;;  %v1218_v29 = vld [vmem:[#allocation2 + $0x94] ss:$8 sps:$4 sm:$0xff]   ;;  %v1220_v30 = vld [vmem:[#allocation2 + $0x90] ss:$8 sps:$4 sm:$0xff]  }
  0x4e   : > { %434 = vmatprep.mubr.bf16.mxu0 %v1333_v0  ;;  %v1221_v31 = vld [vmem:[#allocation2 + $0xa4] ss:$8 sps:$4 sm:$0xff]   ;;  %v1223_v32 = vld [vmem:[#allocation2 + $0xa0] ss:$8 sps:$4 sm:$0xff]   ;;  %v1224_v33 = vld [vmem:[#allocation2 + $0xb4] ss:$8 sps:$4 sm:$0xff]  }
  0x4f   : > { %666 = vmatpush1.bf16.msra.mxu1 %v1199_v15  ;;  %v1226_v34 = vld [vmem:[#allocation2 + $0xb0] ss:$8 sps:$4 sm:$0xff]   ;;  %v1227_v35 = vld [vmem:[#allocation2 + $0xc4] ss:$8 sps:$4 sm:$0xff]   ;;  %v1229_v36 = vld [vmem:[#allocation2 + $0xc0] ss:$8 sps:$4 sm:$0xff]  }
  0x50   : > { %667 = vmatprep.subr.bf16.mxu1 %v1200_v16  ;;  %v1230_v37 = vld [vmem:[#allocation2 + $0xd4] ss:$8 sps:$4 sm:$0xff]   ;;  %v1232_v38 = vld [vmem:[#allocation2 + $0xd0] ss:$8 sps:$4 sm:$0xff]   ;;  %v1233_v39 = vld [vmem:[#allocation2 + $0xe4] ss:$8 sps:$4 sm:$0xff]  }
  0x51   : > { %v1235_v40 = vld [vmem:[#allocation2 + $0xe0] ss:$8 sps:$4 sm:$0xff]   ;;  %v1236_v41 = vld [vmem:[#allocation2 + $0xf4] ss:$8 sps:$4 sm:$0xff]   ;;  %v1238_v42 = vld [vmem:[#allocation2 + $0xf0] ss:$8 sps:$4 sm:$0xff]  }
  0x52   : > { %v1239_v43 = vld [vmem:[#allocation4 + $0x40] sm:$0xff]   ;;  %v1241_v45 = vld [vmem:[#allocation4 + $0x48] sm:$0xff]   ;;  %v1243_v47 = vld [vmem:[#allocation4 + $0x50] sm:$0xff]  }
  0x53   : > { %668 = vmatpush1.bf16.msra.mxu1 %v1202_v18  ;;  %v1240_v44 = vld [vmem:[#allocation4] sm:$0xff]   ;;  %1126 = vmatprep.subr.bf16.mxu0 %v1239_v43  ;;  %v1242_v46 = vld [vmem:[#allocation4 + $0x8] sm:$0xff]   ;;  %v1244_v48 = vld [vmem:[#allocation4 + $0x10] sm:$0xff]  }
  0x54   : > { %669 = vmatprep.subr.bf16.mxu1 %v1203_v19  ;;  %1127 = vmatpush3.bf16.msra.mxu0 %v1240_v44  ;;  %v1245_v49 = vld [vmem:[#allocation4 + $0x58] sm:$0xff]   ;;  %v1247_v51 = vld [vmem:[#allocation4 + $0x60] sm:$0xff]   ;;  %v1249_v53 = vld [vmem:[#allocation4 + $0x68] sm:$0xff]  }
  0x55   : > { %1074 = vmatmul.mubr.msk.bf16.gmra.mrb[4].mxu0 %vm378_vm1, %v359_v17  ;;  %1128 = vmatprep.subr.bf16.mxu0 %v1241_v45  ;;  %v1246_v50 = vld [vmem:[#allocation4 + $0x18] sm:$0xff]   ;;  %v1248_v52 = vld [vmem:[#allocation4 + $0x20] sm:$0xff]  }
  0x56   : > { %v361_v57 = vld [vmem:[%s1508_s2] sm:$0x3] }
  0x57   : > { %670 = vmatpush1.bf16.msra.mxu1 %v1205_v20  ;;  %v366_v59 = vrot.slane %v361_v57, %v365_v56  ;;  %v370_v60 = vrot.slane %v361_v57, %v369_v58 }
  0x58   : > { %671 = vmatprep.subr.bf16.mxu1 %v1206_v21  ;;  %1129 = vmatpush3.bf16.msra.mxu0 %v1242_v46 }
  0x59   : > { %1130 = vmatprep.subr.bf16.mxu0 %v1243_v47 }
  0x5b   : > { %672 = vmatpush1.bf16.msra.mxu1 %v1208_v22 }
  0x5c   : > { %673 = vmatprep.subr.bf16.mxu1 %v1209_v23  ;;  %1131 = vmatpush3.bf16.msra.mxu0 %v1244_v48 }
  0x5d   : > { %1132 = vmatprep.subr.bf16.mxu0 %v1245_v49 }
  0x5f   : > { %674 = vmatpush1.bf16.msra.mxu1 %v1211_v24 }
  0x60   : > { %675 = vmatprep.subr.bf16.mxu1 %v1212_v25  ;;  %1133 = vmatpush3.bf16.msra.mxu0 %v1246_v50  ;;  %v1250_v25 = vld [vmem:[#allocation4 + $0x28] sm:$0xff]  }
  0x61   : > { %1134 = vmatprep.subr.bf16.mxu0 %v1247_v51 }
  0x63   : > { %676 = vmatpush1.bf16.msra.mxu1 %v1214_v26  ;;  %v1251_v26 = vld [vmem:[#allocation4 + $0x70] sm:$0xff]  }
  0x64   : > { %677 = vmatprep.subr.bf16.mxu1 %v1215_v27  ;;  %1135 = vmatpush3.bf16.msra.mxu0 %v1248_v52  ;;  %v1252_v27 = vld [vmem:[#allocation4 + $0x30] sm:$0xff]  }
  0x65   : > { %1136 = vmatprep.subr.bf16.mxu0 %v1249_v53 }
  0x67   : > { %678 = vmatpush1.bf16.msra.mxu1 %v1217_v28  ;;  %v1253_v28 = vld [vmem:[#allocation4 + $0x78] sm:$0xff]  }
  0x68   : > { %679 = vmatprep.subr.bf16.mxu1 %v1218_v29  ;;  %1137 = vmatpush3.bf16.msra.mxu0 %v1250_v25  ;;  %v1254_v29 = vld [vmem:[#allocation4 + $0x38] sm:$0xff]  }
  0x69   : > { %1138 = vmatprep.subr.bf16.mxu0 %v1251_v26 }
  0x6b   : > { %680 = vmatpush1.bf16.msra.mxu1 %v1220_v30  ;;  %v489_v30 = vld [vmem:[%s1510_s4] sm:$0x3] }
  0x6c   : > { %681 = vmatprep.subr.bf16.mxu1 %v1221_v31  ;;  %1139 = vmatpush3.bf16.msra.mxu0 %v1252_v27  ;;  %v494_v31 = vrot.slane %v489_v30, %v365_v56 }
  0x6d   : > { %1140 = vmatprep.subr.bf16.mxu0 %v1253_v28 }
  0x6f   : > { %682 = vmatpush1.bf16.msra.mxu1 %v1223_v32  ;;  %v498_v32 = vrot.slane %v489_v30, %v369_v58 }
  0x70   : > { %683 = vmatprep.subr.bf16.mxu1 %v1224_v33  ;;  %1141 = vmatpush3.bf16.msra.mxu0 %v1254_v29 }
  0x73   : > { %684 = vmatpush1.bf16.msra.mxu1 %v1226_v34 }
  0x74   : > { %685 = vmatprep.subr.bf16.mxu1 %v1227_v35 }
  0x77   : > { %686 = vmatpush1.bf16.msra.mxu1 %v1229_v36 }
  0x78   : > { %687 = vmatprep.subr.bf16.mxu1 %v1230_v37 }
  0x7b   : > { %688 = vmatpush1.bf16.msra.mxu1 %v1232_v38 }
  0x7c   : > { %689 = vmatprep.subr.bf16.mxu1 %v1233_v39 }
  0x7f   : > { %690 = vmatpush1.bf16.msra.mxu1 %v1235_v40 }
  0x80   : > { %691 = vmatprep.subr.bf16.mxu1 %v1236_v41 }
  0x83   : > { %692 = vmatpush1.bf16.msra.mxu1 %v1238_v42 }
 0x120   : > { %v426_v61 = vpop.f32.mrb[0].mxu0 }
 0x121   : > { %v427_v62 = vadd.f32 %v426_v61, %v366_v59  ;;  %v428_v63 = vpop.f32.mrb[1].mxu0 }
 0x122   : > { %v429_v0 = vadd.f32 %v428_v63, %v370_v60  ;;  %v430_v1 = vpop.f32.mrb[2].mxu0 }
 0x123   : > { %v431_v2 = vadd.f32 %v430_v1, %v366_v59  ;;  %v432_v3 = vpop.f32.mrb[3].mxu0  ;;  %v445_v5 = vmax.f32 %v427_v62, 0.0  ;;  %v1107_v62 = vld [vmem:[%s1512_s6] ss:$0 sm:$0xff] }
 0x124   : > { %v433_v4 = vadd.f32 %v432_v3, %v370_v60  ;;  %v446_v7 = vmax.f32 %v429_v0, 0.0 }
 0x125   : > { %v447_v6 = vmax.f32 %v431_v2, 0.0 }
 0x126   : > { %v448_v8 = vmax.f32 %v433_v4, 0.0 }
 0x127   : > { %v453_v9 = vpack.c.bf16 %v447_v6, %v445_v5 }
 0x128   : > { %v436_v10 = vpop.f32.mrb[4].mxu0  ;;  %v454_v11 = vpack.c.bf16 %v448_v8, %v446_v7 }
 0x129   : > { %v437_v12 = vadd.f32 %v436_v10, %v366_v59  ;;  %v438_v13 = vpop.f32.mrb[5].mxu0 }
 0x12a   : > { %v439_v14 = vadd.f32 %v438_v13, %v370_v60  ;;  %v440_v15 = vpop.f32.mrb[6].mxu0  ;;  %693 = vmatprep.mubr.bf16.mxu1 %v454_v11 }
 0x12b   : > { %v441_v16 = vadd.f32 %v440_v15, %v366_v59  ;;  %v442_v17 = vpop.f32.mrb[7].mxu0  ;;  %694 = vmatmul.mubr.bf16.vlgmr.msra.gmra.mrb[0].mxu1 %v453_v9  ;;  %v449_v19 = vmax.f32 %v437_v12, 0.0 }
 0x12c   : > { %v443_v18 = vadd.f32 %v442_v17, %v370_v60  ;;  %v450_v21 = vmax.f32 %v439_v14, 0.0 }
 0x12d   : > { %v451_v20 = vmax.f32 %v441_v16, 0.0 }
 0x12e   : > { %v452_v22 = vmax.f32 %v443_v18, 0.0 }
 0x12f   : > { %v455_v23 = vpack.c.bf16 %v451_v20, %v449_v19 }
 0x130   : > { %v456_v24 = vpack.c.bf16 %v452_v22, %v450_v21 }
 0x132   : > { %703 = vmatprep.mubr.bf16.mxu1 %v456_v24 }
 0x133   : > { %704 = vmatmul.mubr.bf16.gmra.mrb[4].mxu1 %v455_v23 }
 0x1fe   : > { %v695_v33 = vpop.f32.mrb[0].mxu1 }
 0x1ff   : > { %v696_v34 = vadd.f32 %v695_v33, %v494_v31  ;;  %v697_v35 = vpop.f32.mrb[1].mxu1 }
 0x200   : > { %v698_v36 = vadd.f32 %v697_v35, %v498_v32  ;;  %v699_v37 = vpop.f32.mrb[2].mxu1 }
 0x201   : > { %v700_v38 = vadd.f32 %v699_v37, %v494_v31  ;;  %v701_v39 = vpop.f32.mrb[3].mxu1  ;;  %v714_v41 = vmax.f32 %v696_v34, 0.0 }
 0x202   : > { %v702_v40 = vadd.f32 %v701_v39, %v498_v32  ;;  %v715_v43 = vmax.f32 %v698_v36, 0.0 }
 0x203   : > { %v716_v42 = vmax.f32 %v700_v38, 0.0 }
 0x204   : > { %v717_v44 = vmax.f32 %v702_v40, 0.0 }
 0x205   : > { %v722_v45 = vpack.c.bf16 %v716_v42, %v714_v41 }
 0x206   : > { %v723_v46 = vpack.c.bf16 %v717_v44, %v715_v43  ;;  %v705_v47 = vpop.f32.mrb[4].mxu1 }
 0x207   : > { %v706_v48 = vadd.f32 %v705_v47, %v494_v31  ;;  %v707_v49 = vpop.f32.mrb[5].mxu1 }
 0x208   : > { %v708_v50 = vadd.f32 %v707_v49, %v498_v32  ;;  %v709_v51 = vpop.f32.mrb[6].mxu1  ;;  %893 = vmatprep.mubr.bf16.mxu0 %v723_v46 }
 0x209   : > { %v710_v52 = vadd.f32 %v709_v51, %v494_v31  ;;  %v711_v53 = vpop.f32.mrb[7].mxu1  ;;  %894 = vmatmul.mubr.bf16.vlgmr.msra.gmra.mrb[8].mxu0 %v722_v45  ;;  %v718_v55 = vmax.f32 %v706_v48, 0.0 }
 0x20a   : > { %v712_v54 = vadd.f32 %v711_v53, %v498_v32  ;;  %v719_v57 = vmax.f32 %v708_v50, 0.0 }
 0x20b   : > { %v720_v56 = vmax.f32 %v710_v52, 0.0 }
 0x20c   : > { %v721_v58 = vmax.f32 %v712_v54, 0.0 }
 0x20d   : > { %v724_v59 = vpack.c.bf16 %v720_v56, %v718_v55 }
 0x20e   : > { %v725_v60 = vpack.c.bf16 %v721_v58, %v719_v57 }
 0x210   : > { %901 = vmatprep.mubr.bf16.mxu0 %v725_v60 }
 0x211   : > { %902 = vmatmul.mubr.bf16.gmra.mrb[12].mxu0 %v724_v59 }
 0x2dc   : > { %v1142_v61 = vpop.f32.mrb[8].mxu0 }
 0x2dd   : > { %v1143_v63 = vpop.f32.mrb[9].mxu0 }
 0x2de   : > { %v1144_v0 = vadd.f32 %v1143_v63, %v1142_v61  ;;  %v1145_v1 = vpop.f32.mrb[10].mxu0 }
 0x2df   : > { %v1146_v2 = vpop.f32.mrb[11].mxu0 }
 0x2e0   : > { %v896_v3 = vadd.f32 %v1144_v0, %v1107_v62  ;;  %v1147_v4 = vadd.f32 %v1146_v2, %v1145_v1 }
 0x2e2   : > { %911 = vst.msk [vmem:[%s345_s17] sm:$0xff] %vm910_vm2, %v896_v3  ;;  %v899_v5 = vadd.f32 %v1147_v4, %v1107_v62  ;;  %v915_v6 = vmax.f32 %v896_v3, 1e-06 }
 0x2e4   : > { %912 = vst.msk [vmem:[%s345_s17 + $0x8] sm:$0xff] %vm910_vm2, %v899_v5  ;;  %v1148_v7 = vpop.f32.mrb[12].mxu0  ;;  %v919_v8 = vmin.f32 %v915_v6, 1.0  ;;  %v916_v9 = vmax.f32 %v899_v5, 1e-06 }
 0x2e5   : > { %v1149_v10 = vpop.f32.mrb[13].mxu0 }
 0x2e6   : > { %v1150_v11 = vadd.f32 %v1149_v10, %v1148_v7  ;;  %v1151_v12 = vpop.f32.mrb[14].mxu0  ;;  %927 = vrot.lane.b32.xlu0 %v919_v8, %s1334_s29  ;;  %v920_v16 = vmin.f32 %v916_v9, 1.0 }
 0x2e7   : > { %v1152_v13 = vpop.f32.mrb[15].mxu0 }
 0x2e8   : > { %v904_v14 = vadd.f32 %v1150_v11, %v1107_v62  ;;  %v1153_v15 = vadd.f32 %v1152_v13, %v1151_v12 }
 0x2ea   : > { %913 = vst.msk [vmem:[%s345_s17 + $0x10] sm:$0xff] %vm910_vm2, %v904_v14  ;;  %v907_v17 = vadd.f32 %v1153_v15, %v1107_v62  ;;  %929 = vrot.lane.b32.xlu0 %v920_v16, %s1334_s29  ;;  %v917_v18 = vmax.f32 %v904_v14, 1e-06 }
 0x2ec   : > { %914 = vst.msk [vmem:[%s345_s17 + $0x18] sm:$0xff] %vm910_vm2, %v907_v17  ;;  %v921_v19 = vmin.f32 %v917_v18, 1.0  ;;  %v918_v20 = vmax.f32 %v907_v17, 1e-06 }
 0x2ee   : > { %931 = vrot.lane.b32.xlu1 %v921_v19, %s1334_s29  ;;  %v922_v21 = vmin.f32 %v918_v20, 1.0 }
 0x2f2   : > { %933 = vrot.lane.b32.xlu1 %v922_v21, %s1334_s29 }
 0x358   : > { %v928_v22 = vpop.permute.xlu0 %927 }
 0x359   : > { %939 = vst.msk [vmem:[%s351_s20] sm:$0xff] %vm910_vm2, %v928_v22 }
 0x35c   : > { %v930_v23 = vpop.permute.xlu0 %929 }
 0x35d   : > { %940 = vst.msk [vmem:[%s351_s20 + $0x8] sm:$0xff] %vm910_vm2, %v930_v23 }
 0x360   : > { %v932_v24 = vpop.permute.xlu1 %931 }
 0x361   : > { %941 = vst.msk [vmem:[%s351_s20 + $0x10] sm:$0xff] %vm910_vm2, %v932_v24 }
 0x364   : > { %v934_v25 = vpop.permute.xlu1 %933 }
 0x365   : > { %942 = vst.msk [vmem:[%s351_s20 + $0x18] sm:$0xff] %vm910_vm2, %v934_v25 }
 0x366 PF: > { %s21_s27 = sadd.s32 1, %s1325_s27  }
 0x367   : > { %p18_p2 = scmp.ge.s32.totalorder %s21_s27, 4  }
 0x369   :  { %20 = sbr.rel (!%p18_p2) target bundleno = 2 (0x2), region = 99 }
 0x370   :  { %982 = vsyncpa [#allocation3], 1 }
 0x371   :  { %984 = vsyncpa [#allocation3 + $0x1], 1 }
 0x372   :  { %985 = vsyncpa [#allocation5], 1 }

</bundles_post_ra>
